<compile_context>
chip_gen: v5e
topology: v5e:2x2
jax: 0.10.0
libtpu: 0.0.40
codegen_flags: <defaults>
</compile_context>

<pallas_src>
import functools

import jax
import jax.numpy as jnp
from jax.experimental import pallas as pl
from jax.experimental.pallas import tpu as pltpu


def _round_up(n, m):
    return ((n + m - 1) // m) * m


def simplenet_kernel(x_ref, w1_ref, b1_ref, w2_ref, b2_ref, out_ref):
    x = x_ref[...]                                                     # (TILE_B, 10) f32
    # Layer 1 on the MXU, f32 accumulate.
    h = jnp.dot(x, w1_ref[...], preferred_element_type=jnp.float32)   # (TILE_B, 20)
    h = jnp.maximum(h + b1_ref[...], 0.0)                             # bias + ReLU (VPU)
    # Layer 2: out_features == 1 -> multiply + lane reduce on VPU/XLU instead of
    # an N=1 MXU matmul. w2_ref is the weight row, shape (1, 20).
    y = jnp.sum(h * w2_ref[...], axis=-1, keepdims=True) + b2_ref[...]  # (TILE_B, 1)
    out_ref[...] = y.astype(out_ref.dtype)


@functools.partial(jax.jit, static_argnames=("tile_b",))
def simplenet_forward(x, w1, b1, w2, b2, *, tile_b=2048):
    """x: (B, 10) f32; w1: (10, 20); b1: (20,); w2: (20, 1); b2: (1,) -> (B, 1) f32."""
    B = x.shape[0]
    in_f, hid = w1.shape                      # (10, 20)

    # Pick a batch tile: large for pipelining, but never larger than (padded) B.
    tile_b = min(tile_b, _round_up(B, 8))
    b_pad = _round_up(B, tile_b)
    if b_pad != B:
        x = jnp.pad(x, ((0, b_pad - B), (0, 0)))   # padded rows sliced off below

    b1_2d = b1.reshape(1, hid)                 # (1, 20)
    w2_row = w2.reshape(1, hid)                # (1, 20)  second-layer weight as a row
    b2_2d = b2.reshape(1, 1)                   # (1, 1)

    grid = (b_pad // tile_b,)
    dtype_bytes = x.dtype.itemsize
    weight_bytes = (w1.size + b1.size + w2.size + b2.size) * 4
    cost = pl.CostEstimate(
        flops=2 * b_pad * (in_f * hid + hid),
        transcendentals=0,
        bytes_accessed=b_pad * (in_f + 1) * dtype_bytes + weight_bytes,
    )

    out = pl.pallas_call(
        simplenet_kernel,
        out_shape=jax.ShapeDtypeStruct((b_pad, 1), jnp.float32),
        grid=grid,
        in_specs=[
            pl.BlockSpec((tile_b, in_f), lambda i: (i, 0)),    # x: tiled over batch
            pl.BlockSpec(w1.shape, lambda i: (0, 0)),          # W1 resident in VMEM
            pl.BlockSpec(b1_2d.shape, lambda i: (0, 0)),       # b1 resident
            pl.BlockSpec(w2_row.shape, lambda i: (0, 0)),      # w2 row resident
            pl.BlockSpec(b2_2d.shape, lambda i: (0, 0)),       # b2 resident
        ],
        out_specs=pl.BlockSpec((tile_b, 1), lambda i: (i, 0)),
        compiler_params=pltpu.CompilerParams(
            dimension_semantics=("parallel",),    # independent batch tiles (v7x 2-TC)
            vmem_limit_bytes=32 * 1024 * 1024,    # safe on v5e/v6e/v7x, >> our usage
        ),
        cost_estimate=cost,
    )(x, w1, b1_2d, w2_row, b2_2d)

    return out[:B]


def init_params(key):
    """Deterministic init mimicking nn.Linear's U(-1/sqrt(fan_in), 1/sqrt(fan_in))."""
    k1, k2, k3, k4 = jax.random.split(key, 4)
    lim1 = 1.0 / jnp.sqrt(10.0)
    lim2 = 1.0 / jnp.sqrt(20.0)
    # Stored as (in_features, out_features) == PyTorch weight.T
    w1 = jax.random.uniform(k1, (10, 20), jnp.float32, -lim1, lim1)
    b1 = jax.random.uniform(k2, (20,), jnp.float32, -lim1, lim1)
    w2 = jax.random.uniform(k3, (20, 1), jnp.float32, -lim2, lim2)
    b2 = jax.random.uniform(k4, (1,), jnp.float32, -lim2, lim2)
    return w1, b1, w2, b2


if __name__ == "__main__":
    key = jax.random.PRNGKey(0)
    kx, kx2, kp = jax.random.split(key, 3)

    w1, b1, w2, b2 = init_params(kp)

    # Small demo batch (single grid step, tile shrinks to the padded batch).
    B = 8
    x = jax.random.normal(kx, (B, 10), jnp.float32)
    out = simplenet_forward(x, w1, b1, w2, b2)
    jax.block_until_ready(out)
    ref = jnp.maximum(x @ w1 + b1, 0.0) @ w2 + b2
    assert out.shape == (B, 1)
    assert jnp.allclose(out, ref, atol=1e-5, rtol=1e-5)

    # Larger, non-multiple batch to exercise batch tiling + tail padding.
    B2 = 5000  # not a multiple of the 2048 tile
    x2 = jax.random.normal(kx2, (B2, 10), jnp.float32)
    out2 = simplenet_forward(x2, w1, b1, w2, b2)
    jax.block_until_ready(out2)
    ref2 = jnp.maximum(x2 @ w1 + b1, 0.0) @ w2 + b2
    assert out2.shape == (B2, 1)
    assert jnp.allclose(out2, ref2, atol=1e-4, rtol=1e-4)

    print("KERNEL_OK")
</pallas_src>

<mosaic_0001>
module attributes {stable_mosaic.version = 11 : i64} {
  func.func @simplenet_kernel(%arg0: i32, %arg1: memref<8x10xf32, #tpu.memory_space<vmem>>, %arg2: memref<10x20xf32, #tpu.memory_space<vmem>>, %arg3: memref<1x20xf32, #tpu.memory_space<vmem>>, %arg4: memref<1x20xf32, #tpu.memory_space<vmem>>, %arg5: memref<1x1xf32, #tpu.memory_space<vmem>>, %arg6: memref<8x1xf32, #tpu.memory_space<vmem>>) attributes {dimension_semantics = [#tpu.dimension_semantics<parallel>], iteration_bounds = array<i64: 1>, scalar_prefetch = 0 : i64, scratch_operands = 0 : i64, tpu.core_type = #tpu.core_type<tc>, window_params = [{transform_indices = @transform_0, window_bounds = array<i64: 8, 10>}, {pipeline_mode = #tpu.pipeline_mode<synchronous>, transform_indices = @transform_1, window_bounds = array<i64: 10, 20>}, {pipeline_mode = #tpu.pipeline_mode<synchronous>, transform_indices = @transform_2, window_bounds = array<i64: 1, 20>}, {pipeline_mode = #tpu.pipeline_mode<synchronous>, transform_indices = @transform_3, window_bounds = array<i64: 1, 20>}, {pipeline_mode = #tpu.pipeline_mode<synchronous>, transform_indices = @transform_4, window_bounds = array<i64: 1, 1>}, {transform_indices = @transform_5, window_bounds = array<i64: 8, 1>}]} {
    %c0 = arith.constant 0 : index
    %c0_0 = arith.constant 0 : index
    %0 = vector.load %arg1[%c0, %c0_0] : memref<8x10xf32, #tpu.memory_space<vmem>>, vector<8x10xf32>
    %c0_1 = arith.constant 0 : index
    %c0_2 = arith.constant 0 : index
    %1 = vector.load %arg2[%c0_1, %c0_2] : memref<10x20xf32, #tpu.memory_space<vmem>>, vector<10x20xf32>
    %cst = arith.constant dense<0.000000e+00> : vector<8x20xf32>
    %2 = tpu.matmul %0, %1, %cst {dimension_numbers = #tpu.dot_dimension_numbers<[1], [0], [0], [1], [0, 0, 1, 1], [], []>} : vector<8x10xf32>, vector<10x20xf32>, vector<8x20xf32> -> vector<8x20xf32>
    %c0_3 = arith.constant 0 : index
    %c0_4 = arith.constant 0 : index
    %3 = vector.load %arg3[%c0_3, %c0_4] : memref<1x20xf32, #tpu.memory_space<vmem>>, vector<1x20xf32>
    %4 = vector.broadcast %3 : vector<1x20xf32> to vector<8x20xf32>
    %5 = arith.addf %2, %4 : vector<8x20xf32>
    %cst_5 = arith.constant 0.000000e+00 : f32
    %6 = vector.broadcast %cst_5 : f32 to vector<8x20xf32>
    %7 = arith.maximumf %5, %6 : vector<8x20xf32>
    %c0_6 = arith.constant 0 : index
    %c0_7 = arith.constant 0 : index
    %8 = vector.load %arg4[%c0_6, %c0_7] : memref<1x20xf32, #tpu.memory_space<vmem>>, vector<1x20xf32>
    %9 = vector.broadcast %8 : vector<1x20xf32> to vector<8x20xf32>
    %10 = arith.mulf %7, %9 : vector<8x20xf32>
    %cst_8 = arith.constant dense<0.000000e+00> : vector<8xf32>
    %11 = vector.multi_reduction <add>, %10, %cst_8 [1] : vector<8x20xf32> to vector<8xf32>
    %12 = vector.shape_cast %11 : vector<8xf32> to vector<8x1xf32>
    %c0_9 = arith.constant 0 : index
    %c0_10 = arith.constant 0 : index
    %13 = vector.load %arg5[%c0_9, %c0_10] : memref<1x1xf32, #tpu.memory_space<vmem>>, vector<1x1xf32>
    %14 = vector.broadcast %13 : vector<1x1xf32> to vector<8x1xf32>
    %15 = arith.addf %12, %14 : vector<8x1xf32>
    %c0_11 = arith.constant 0 : index
    %c0_12 = arith.constant 0 : index
    %16 = vector.load %arg6[%c0_11, %c0_12] : memref<8x1xf32, #tpu.memory_space<vmem>>, vector<8x1xf32>
    tpu.vector_store %arg6[%c0_11, %c0_12], %15 {strides = array<i32>} : memref<8x1xf32, #tpu.memory_space<vmem>>, vector<8x1xf32>,
    return
  }
  func.func @transform_0(%arg0: i32) -> (i32, i32) {
    %c0_i32 = arith.constant 0 : i32
    %c0_i32_0 = arith.constant 0 : i32
    return %arg0, %c0_i32 : i32, i32
  }
  func.func @transform_1(%arg0: i32) -> (i32, i32) {
    %c0_i32 = arith.constant 0 : i32
    %c0_i32_0 = arith.constant 0 : i32
    %c0_i32_1 = arith.constant 0 : i32
    return %c0_i32, %c0_i32_0 : i32, i32
  }
  func.func @transform_2(%arg0: i32) -> (i32, i32) {
    %c0_i32 = arith.constant 0 : i32
    %c0_i32_0 = arith.constant 0 : i32
    %c0_i32_1 = arith.constant 0 : i32
    return %c0_i32, %c0_i32_0 : i32, i32
  }
  func.func @transform_3(%arg0: i32) -> (i32, i32) {
    %c0_i32 = arith.constant 0 : i32
    %c0_i32_0 = arith.constant 0 : i32
    %c0_i32_1 = arith.constant 0 : i32
    return %c0_i32, %c0_i32_0 : i32, i32
  }
  func.func @transform_4(%arg0: i32) -> (i32, i32) {
    %c0_i32 = arith.constant 0 : i32
    %c0_i32_0 = arith.constant 0 : i32
    %c0_i32_1 = arith.constant 0 : i32
    return %c0_i32, %c0_i32_0 : i32, i32
  }
  func.func @transform_5(%arg0: i32) -> (i32, i32) {
    %c0_i32 = arith.constant 0 : i32
    %c0_i32_0 = arith.constant 0 : i32
    return %arg0, %c0_i32 : i32, i32
  }
}

</mosaic_0001>

<bundles_post_ra>
// kernel: simplenet_forward.1
= control target key start
LH: loop header
LB: loop body
LE: loop exit
PB: predicated region body
PF: predicated region fallthrough
CT: control target
= control target key end

     0   :  { %s223_s0 = inlined_call_operand.hbm [shape: f32[8,10], index: 0, kind: input, shape index: {}]   ;;  %s224_s1 = inlined_call_operand.hbm [shape: f32[10,20], index: 1, kind: input, shape index: {}]   ;;  %s225_s2 = inlined_call_operand.vmem [shape: f32[1,20], index: 2, kind: input, shape index: {}]   ;;  %s226_s3 = inlined_call_operand.vmem [shape: f32[1,20], index: 3, kind: input, shape index: {}]   ;;  %s227_s4 = inlined_call_operand.<no memory space> [shape: f32[1,1], index: 4, kind: input, shape index: {}]   ;;  %s228_s5 = inlined_call_operand.vmem [shape: f32[8,1], index: 5, kind: output, shape index: {}]  }
   0x1   :  { %v10_v0 = vstv %s227_s4 }
   0x2   :  { %11 = vst [vmem:[#allocation2] sm:$0x1] %v10_v0 }
   0x3   :  { %12 = vsyncpa [#allocation4], 0  ;;  %s19_s22 = sshll.u32 %s223_s0, 4  ;;  %s20_s22 = int_to_ptr.hbm [resolvable:$true] %s19_s22 }
   0x4   :  { %13 = vsyncpa [#allocation6], 0  ;;  %s171_s23 = smov [#allocation3]   ;;  %s29_s27 = sshll.u32 %s224_s1, 4  ;;  %s30_s27 = int_to_ptr.hbm [resolvable:$true] %s29_s27 }
   0x5   :  { %s21_s24 = sshll.u32 %s171_s23, 4  ;;  %s172_s28 = smov [#allocation5]   ;;  %s22_s24 = int_to_ptr.vmem [resolvable:$true] %s21_s24 }
   0x6   :  { %24 = dma.hbm_to_vmem [thread:$0]  %s20_s22, 128, %s22_s24, [#allocation4]  }
   0x7   :  { %s31_s29 = sshll.u32 %s172_s28, 4  ;;  %s173_s4 = smov 128   ;;  %s32_s29 = int_to_ptr.vmem [resolvable:$true] %s31_s29 }
   0x8   :  { %s174_s30 = smov 8  }
   0x9   :  { %37 = dma.hbm_to_vmem [thread:$0]  %s30_s27, 256, %s32_s29, [#allocation6], %s173_s4, %s173_s4, %s174_s30  }
   0xa   :  { %167 = dma.done.wait [#allocation4], 128  }
   0xb   :  { %168 = vsyncadd [#allocation4], 4294967168 }
   0xc   :  { %169 = dma.done.wait [#allocation6], 256  }
   0xd   :  { %170 = vsyncadd [#allocation6], 4294967040  ;;  %vm63_vm0 = vcmask 1041408   ;;  %v54_v1 = vld [vmem:[#allocation5 + $0x8] sm:$0x3]  ;;  %v53_v2 = vld [vmem:[#allocation5] sm:$0xff] }
   0xe   :  { %110 = vmatpush.msk.msra.mxu0 %vm63_vm0, %v54_v1  ;;  %v52_v3 = vld [vmem:[#allocation3] sm:$0xff]  ;;  %vm59_vm1 = vcmask 80896   ;;  %v116_v4 = vld [vmem:[%s225_s2] ss:$0 sm:$0xff]  ;;  %vm93_vm2 = vcmask 162816   ;;  %vm102_vm3 = vcmask 7168  }
   0xf   :  { %v117_v7 = vld [vmem:[%s226_s3] ss:$0 sm:$0xff] }
  0x10   :  { %82 = vmatpush.msra.mxu0 %v53_v2  ;;  %v118_v11 = vld [vmem:[#allocation2] ss:$0 sm:$0xff] }
  0x11   :  { %111 = vmatmul.msk.f32.vlgmr.msra.gmra.mxu0 %vm59_vm1, %v52_v3 }
  0x8e   :  { %v84_v5 = vpop.f32.mrf.mxu0 }
  0x8f   :  { %v85_v6 = vadd.f32 %v116_v4, %v84_v5 }
  0x91   :  { %v87_v8 = vmax.f32 %v85_v6, 0.0 }
  0x93   :  { %v92_v9 = vmul.f32 %v117_v7, %v87_v8 }
  0x95   :  { %v94_v10 = vsel %vm93_vm2, %v92_v9, 0.0 }
  0x96   :  { %95 = vadd.xlane.f32.xlu0 %v94_v10 }
 0x109   :  { %v96_v12 = vpop.xlane.xlu0 %95 }
 0x10a   :  { %v101_v13 = vadd.f32 %v118_v11, %v96_v12 }
 0x10c   :  { %103 = vst.msk [vmem:[%s228_s5] sm:$0xff] %vm102_vm3, %v101_v13 }
 0x10d   :  { %108 = vsyncpa [#allocation4], 1 }
 0x10e   :  { %109 = vsyncpa [#allocation6], 1 }

</bundles_post_ra>
